<compile_context>
chip_gen: v5e
topology: v5e:2x2
jax: 0.10.0
libtpu: 0.0.40
codegen_flags: <defaults>
</compile_context>

<pallas_src>
import functools

import jax
import jax.numpy as jnp
from jax.experimental import pallas as pl
from jax.experimental.pallas import tpu as pltpu


# --------------------------------------------------------------------------------------
# Hardware introspection (trace-time, best effort).
# --------------------------------------------------------------------------------------
def _device_kind():
    try:
        return jax.devices()[0].device_kind.lower()
    except Exception:
        return ""


def _tpu_vmem_bytes():
    try:
        info = pltpu.get_tpu_info()
        v = getattr(info, "vmem_capacity_bytes", None)
        if v:
            return int(v)
    except Exception:
        pass
    # Fallback: v7x has 64 MiB / TensorCore, older parts 128 MiB.
    return (64 << 20) if "v7" in _device_kind() else (128 << 20)


def _has_bf16_vpu():
    # v6e (Trillium) and v7x have bf16 VALU/EUP; v5e and older do not.
    kind = _device_kind()
    return ("v6" in kind) or ("v7" in kind) or ("trillium" in kind)


# --------------------------------------------------------------------------------------
# Kernel
# --------------------------------------------------------------------------------------
def _smoothing_ce_kernel(labels_ref, logits_ref, out_ref, *, epsilon, bf16_native):
    """Per-tile row losses.

    logits_ref: (TILE_N, C) input dtype; labels_ref: (TILE_N, 1) int32;
    out_ref: (1, 1, TILE_N) float32 (lane-dense row of losses).
    """
    x_in = logits_ref[...]                       # (tn, C), input dtype
    labels = labels_ref[...]                     # (tn, 1) int32
    tn, C = x_in.shape

    eps_off = float(epsilon) / (C - 1) if C > 1 else 0.0
    w_label = 1.0 - float(epsilon) - eps_off

    # Class-index iota as a single (1, C) row; the compare broadcasts it against the
    # (tn, 1) labels column — no full (tn, C) int32 temporary is materialized.
    col = jax.lax.broadcasted_iota(jnp.int32, (1, C), 1)
    is_label = col == labels                     # (tn, C) bool

    if bf16_native:
        # v6e / v7x with bf16 inputs: keep the wide max / subtract in native bf16
        # (2x elements per vreg), upcast the shifted values once, accumulate in f32.
        m = jnp.max(x_in, axis=1, keepdims=True)                     # bf16 (tn, 1)
        m_f32 = m.astype(jnp.float32)
        shifted = (x_in - m).astype(jnp.float32)                     # (tn, C) f32
        sum_e = jnp.sum(jnp.exp(shifted), axis=1, keepdims=True)     # f32 accumulation
        denom = m_f32 + jnp.log(sum_e)                               # logsumexp (tn, 1)
        # Label logit via iota-compare-select on the shifted values (exactly one hit
        # per valid row): z_label = sum(selected shifted) + m.
        z_label = jnp.sum(jnp.where(is_label, shifted, 0.0),
                          axis=1, keepdims=True) + m_f32
        # Plain row sum on the (otherwise idle) MXU; bf16 inputs are MXU-native so the
        # f32-accumulated dot is exact w.r.t. the bf16 data.
        ones_c = jnp.ones((C, 1), dtype=x_in.dtype)
        z_sum = jnp.dot(x_in, ones_c, preferred_element_type=jnp.float32)
    else:
        # f32 path (all f32 inputs; bf16 inputs on v5e which lacks a bf16 VPU/EUP).
        x = x_in.astype(jnp.float32)
        m = jnp.max(x, axis=1, keepdims=True)
        sum_e = jnp.sum(jnp.exp(x - m), axis=1, keepdims=True)
        denom = m + jnp.log(sum_e)
        z_label = jnp.sum(jnp.where(is_label, x, 0.0), axis=1, keepdims=True)
        # Keep the plain sum on the VPU here: an f32 MXU dot would truncate inputs to
        # bf16 under default precision and break the 1e-5 tolerance.
        z_sum = jnp.sum(x, axis=1, keepdims=True)

    losses = denom - (w_label * z_label + eps_off * z_sum)           # (tn, 1) f32
    # Lane-dense store: one (1, 1, tn) row block -> unmasked full-lane vst.
    out_ref[...] = losses.reshape(1, 1, tn)


# --------------------------------------------------------------------------------------
# Tiling / VMEM planning (generation aware)
# --------------------------------------------------------------------------------------
def _plan_tiling(n, c, in_itemsize):
    vmem_bytes = _tpu_vmem_bytes()
    small_vmem = vmem_bytes < (100 << 20)        # v7x: 64 MiB per TensorCore
    vmem_cap = (48 << 20) if small_vmem else (80 << 20)   # scoped-VMEM ceiling we use
    tile_cap = (4 << 20) if small_vmem else (8 << 20)     # logits-tile byte budget
    slack = 2 << 20                                        # labels / output / misc

    # Per-element VMEM footprint: double-buffered input tile + ~5 full-width f32 temps.
    per_elem = 2 * in_itemsize + 5 * 4

    t_by_vmem = (vmem_cap - slack) // max(1, c * per_elem)
    t_by_tile = tile_cap // max(1, c * in_itemsize)
    t = min(t_by_vmem, t_by_tile, 32768)         # raised row cap (was 1024)

    # Round rows to the dtype's sublane packing (8 for f32, 16 for bf16, 32 for int8).
    mult = max(8, 32 // max(1, in_itemsize))
    n_pad = ((n + mult - 1) // mult) * mult
    t = max(mult, (t // mult) * mult)
    tile_n = int(min(t, n_pad))

    need = 2 * tile_n * c * in_itemsize + 5 * tile_n * c * 4 + slack
    vmem_limit = int(min(vmem_cap, max(24 << 20, need)))
    return tile_n, vmem_limit


# --------------------------------------------------------------------------------------
# Public wrapper
# --------------------------------------------------------------------------------------
def smoothing_label_cross_entropy(logits, labels, epsilon=0.1, reduction='mean'):
    """logits: (N, C) float; labels: (N,) int. Matches the PyTorch module's forward."""
    N, C = logits.shape
    labels2d = labels.astype(jnp.int32).reshape(N, 1)

    in_itemsize = jnp.dtype(logits.dtype).itemsize
    bf16_native = (logits.dtype == jnp.bfloat16) and _has_bf16_vpu()

    tile_n, vmem_limit = _plan_tiling(N, C, in_itemsize)
    num_tiles = pl.cdiv(N, tile_n)

    kernel = functools.partial(_smoothing_ce_kernel,
                               epsilon=float(epsilon),
                               bf16_native=bool(bf16_native))

    out = pl.pallas_call(
        kernel,
        out_shape=jax.ShapeDtypeStruct((num_tiles, 1, tile_n), jnp.float32),
        grid=(num_tiles,),
        in_specs=[
            pl.BlockSpec((tile_n, 1), lambda i: (i, 0)),   # labels column
            pl.BlockSpec((tile_n, C), lambda i: (i, 0)),   # logits (full class width)
        ],
        out_specs=pl.BlockSpec((1, 1, tile_n), lambda i: (i, 0, 0)),  # lane-dense losses
        compiler_params=pltpu.CompilerParams(
            dimension_semantics=("parallel",),
            vmem_limit_bytes=vmem_limit,
        ),
    )(labels2d, logits)

    # Padded tail rows (N % tile_n != 0) hold garbage; slice them off before reducing.
    losses = out.reshape(num_tiles * tile_n)[:N]

    if reduction == 'none':
        return losses
    elif reduction == 'sum':
        return jnp.sum(losses)
    elif reduction == 'mean':
        return jnp.sum(losses) / N               # global batch size, not a tile size
    else:
        raise AssertionError('reduction has to be none, mean or sum')


class SmoothingLabelCrossEntropyLoss:
    """JAX/Pallas port of the PyTorch module (no learnable parameters)."""

    def __init__(self, epsilon=0.1, reduction='mean'):
        self._epsilon = epsilon
        self._reduction = reduction

    def __call__(self, logits, labels):
        return smoothing_label_cross_entropy(logits, labels,
                                             epsilon=self._epsilon,
                                             reduction=self._reduction)


# --------------------------------------------------------------------------------------
# Pure-JAX reference + self-test
# --------------------------------------------------------------------------------------
def _reference(logits, labels, epsilon=0.1, reduction='mean'):
    N, C = logits.shape
    smoothed = jnp.full((N, C), epsilon / (C - 1), dtype=jnp.float32)
    smoothed = smoothed.at[jnp.arange(N), labels].set(1.0 - epsilon)
    log_probs = jax.nn.log_softmax(logits.astype(jnp.float32), axis=1)
    losses = -jnp.sum(log_probs * smoothed, axis=1)
    if reduction == 'none':
        return losses
    elif reduction == 'sum':
        return jnp.sum(losses)
    return jnp.sum(losses) / N


if __name__ == "__main__":
    key = jax.random.PRNGKey(0)
    k1, k2, k3 = jax.random.split(key, 3)

    # Small f32 case: N=8 rows, C=32 classes.
    N, C = 8, 32
    logits = jax.random.normal(k1, (N, C), dtype=jnp.float32)
    labels = jax.random.randint(k2, (N,), 0, C, dtype=jnp.int32)

    loss_fn = SmoothingLabelCrossEntropyLoss(epsilon=0.1, reduction='mean')
    loss = loss_fn(logits, labels)
    jax.block_until_ready(loss)
    ref = _reference(logits, labels, 0.1, 'mean')
    assert jnp.allclose(loss, ref, rtol=1e-5, atol=1e-5), (loss, ref)

    loss_none = smoothing_label_cross_entropy(logits, labels, 0.1, 'none')
    jax.block_until_ready(loss_none)
    ref_none = _reference(logits, labels, 0.1, 'none')
    assert jnp.allclose(loss_none, ref_none, rtol=1e-5, atol=1e-5)

    loss_sum = smoothing_label_cross_entropy(logits, labels, 0.1, 'sum')
    jax.block_until_ready(loss_sum)
    ref_sum = _reference(logits, labels, 0.1, 'sum')
    assert jnp.allclose(loss_sum, ref_sum, rtol=1e-5, atol=1e-5)

    # Ragged batch (exercises padded tail rows + lane-dense output slicing).
    N2, C2 = 13, 32
    logits2 = jax.random.normal(k3, (N2, C2), dtype=jnp.float32)
    labels2 = jax.random.randint(k2, (N2,), 0, C2, dtype=jnp.int32)
    l2 = smoothing_label_cross_entropy(logits2, labels2, 0.1, 'none')
    jax.block_until_ready(l2)
    r2 = _reference(logits2, labels2, 0.1, 'none')
    assert jnp.allclose(l2, r2, rtol=1e-5, atol=1e-5)
    l2m = smoothing_label_cross_entropy(logits2, labels2, 0.1, 'mean')
    r2m = _reference(logits2, labels2, 0.1, 'mean')
    assert jnp.allclose(l2m, r2m, rtol=1e-5, atol=1e-5)

    # bf16 logits (bf16-native VPU/MXU path on v6e/v7x, f32 upcast path on v5e).
    logits_bf16 = logits.astype(jnp.bfloat16)
    lb = smoothing_label_cross_entropy(logits_bf16, labels, 0.1, 'mean')
    jax.block_until_ready(lb)
    rb = _reference(logits_bf16, labels, 0.1, 'mean')
    assert jnp.allclose(lb, rb, rtol=2e-2, atol=2e-2), (lb, rb)

    print("KERNEL_OK")
</pallas_src>

<mosaic_0001>
module attributes {stable_mosaic.version = 11 : i64} {
  func.func @_smoothing_ce_kernel(%arg0: i32, %arg1: memref<8x1xi32, #tpu.memory_space<vmem>>, %arg2: memref<8x32xf32, #tpu.memory_space<vmem>>, %arg3: memref<1x1x8xf32, #tpu.memory_space<vmem>>) attributes {dimension_semantics = [#tpu.dimension_semantics<parallel>], iteration_bounds = array<i64: 1>, scalar_prefetch = 0 : i64, scratch_operands = 0 : i64, tpu.core_type = #tpu.core_type<tc>, window_params = [{transform_indices = @transform_0, window_bounds = array<i64: 8, 1>}, {transform_indices = @transform_1, window_bounds = array<i64: 8, 32>}, {transform_indices = @transform_2, window_bounds = array<i64: 1, 1, 8>}]} {
    %c0 = arith.constant 0 : index
    %c0_0 = arith.constant 0 : index
    %0 = vector.load %arg2[%c0, %c0_0] : memref<8x32xf32, #tpu.memory_space<vmem>>, vector<8x32xf32>
    %c0_1 = arith.constant 0 : index
    %c0_2 = arith.constant 0 : index
    %1 = vector.load %arg1[%c0_1, %c0_2] : memref<8x1xi32, #tpu.memory_space<vmem>>, vector<8x1xi32>
    %2 = tpu.iota {dimensions = array<i32: 1>} : vector<1x32xi32>
    %3 = vector.broadcast %2 : vector<1x32xi32> to vector<8x32xi32>
    %4 = vector.broadcast %1 : vector<8x1xi32> to vector<8x32xi32>
    %5 = arith.cmpi eq, %3, %4 : vector<8x32xi32>
    %cst = arith.constant dense<0xFF800000> : vector<8xf32>
    %6 = vector.multi_reduction <maximumf>, %0, %cst [1] : vector<8x32xf32> to vector<8xf32>
    %7 = vector.shape_cast %6 : vector<8xf32> to vector<8x1xf32>
    %8 = vector.broadcast %7 : vector<8x1xf32> to vector<8x32xf32>
    %9 = arith.subf %0, %8 : vector<8x32xf32>
    %10 = math.exp %9 : vector<8x32xf32>
    %cst_3 = arith.constant dense<0.000000e+00> : vector<8xf32>
    %11 = vector.multi_reduction <add>, %10, %cst_3 [1] : vector<8x32xf32> to vector<8xf32>
    %12 = vector.shape_cast %11 : vector<8xf32> to vector<8x1xf32>
    %13 = math.log %12 : vector<8x1xf32>
    %14 = arith.addf %7, %13 : vector<8x1xf32>
    %cst_4 = arith.constant 0.000000e+00 : f32
    %15 = vector.broadcast %cst_4 : f32 to vector<8x32xf32>
    %16 = arith.select %5, %0, %15 : vector<8x32xi1>, vector<8x32xf32>
    %cst_5 = arith.constant dense<0.000000e+00> : vector<8xf32>
    %17 = vector.multi_reduction <add>, %16, %cst_5 [1] : vector<8x32xf32> to vector<8xf32>
    %18 = vector.shape_cast %17 : vector<8xf32> to vector<8x1xf32>
    %cst_6 = arith.constant dense<0.000000e+00> : vector<8xf32>
    %19 = vector.multi_reduction <add>, %0, %cst_6 [1] : vector<8x32xf32> to vector<8xf32>
    %20 = vector.shape_cast %19 : vector<8xf32> to vector<8x1xf32>
    %cst_7 = arith.constant 0.896774172 : f32
    %21 = vector.broadcast %cst_7 : f32 to vector<8x1xf32>
    %22 = arith.mulf %21, %18 : vector<8x1xf32>
    %cst_8 = arith.constant 0.0032258064 : f32
    %23 = vector.broadcast %cst_8 : f32 to vector<8x1xf32>
    %24 = arith.mulf %23, %20 : vector<8x1xf32>
    %25 = arith.addf %22, %24 : vector<8x1xf32>
    %26 = arith.subf %14, %25 : vector<8x1xf32>
    %27 = vector.shape_cast %26 : vector<8x1xf32> to vector<1x1x8xf32>
    %c0_9 = arith.constant 0 : index
    %c0_10 = arith.constant 0 : index
    %c0_11 = arith.constant 0 : index
    %28 = vector.load %arg3[%c0_9, %c0_10, %c0_11] : memref<1x1x8xf32, #tpu.memory_space<vmem>>, vector<1x1x8xf32>
    tpu.vector_store %arg3[%c0_9, %c0_10, %c0_11], %27 {strides = array<i32>} : memref<1x1x8xf32, #tpu.memory_space<vmem>>, vector<1x1x8xf32>,
    return
  }
  func.func @transform_0(%arg0: i32) -> (i32, i32) {
    %c0_i32 = arith.constant 0 : i32
    %c0_i32_0 = arith.constant 0 : i32
    return %arg0, %c0_i32 : i32, i32
  }
  func.func @transform_1(%arg0: i32) -> (i32, i32) {
    %c0_i32 = arith.constant 0 : i32
    %c0_i32_0 = arith.constant 0 : i32
    return %arg0, %c0_i32 : i32, i32
  }
  func.func @transform_2(%arg0: i32) -> (i32, i32, i32) {
    %c0_i32 = arith.constant 0 : i32
    %c0_i32_0 = arith.constant 0 : i32
    %c0_i32_1 = arith.constant 0 : i32
    return %arg0, %c0_i32, %c0_i32_0 : i32, i32, i32
  }
}

</mosaic_0001>

<bundles_post_ra>
// kernel: tpu_custom_call.1
= control target key start
LH: loop header
LB: loop body
LE: loop exit
PB: predicated region body
PF: predicated region fallthrough
CT: control target
= control target key end

     0   :  { %vm20_vm0 = vcmask 261120   ;;  %s128_s0 = inlined_call_operand.vmem [shape: s32[8,1], index: 0, kind: input, shape index: {}]   ;;  %s129_s1 = inlined_call_operand.vmem [shape: f32[8,32], index: 1, kind: input, shape index: {}]   ;;  %s130_s2 = inlined_call_operand.hbm [shape: f32[1,1,8], index: 2, kind: output, shape index: {}]  }
   0x1   :  { %v12_v0 = vld [vmem:[%s129_s1] sm:$0xff] }
   0x2   :  { %7 = vsyncpa [#allocation3], 0  ;;  %v21_v1 = vsel %vm20_vm0, %v12_v0, -inf  ;;  %v98_v2 = vmov 0   ;;  %v13_v3 = vld [vmem:[%s128_s0] sm:$0xff]  ;;  %v37_v4 = vsel %vm20_vm0, %v12_v0, 0.0  ;;  %v14_v10 = vlaneseq }
   0x3   :  { %67 = vset.pattern.permute.xlu0 %v98_v2  ;;  %38 = vadd.xlane.f32.xlu2 %v37_v4  ;;  %s99_s0 = smov [#allocation2]   ;;  %s56_s15 = sshll.u32 %s130_s2, 4  ;;  %vm47_vm2 = vcmask 57344   ;;  %s57_s15 = int_to_ptr.hbm [resolvable:$true] %s56_s15 }
   0x4   :  { %22 = vmax.xlane.f32.xlu0 %v21_v1  ;;  %v15_v11 = vand.u32 127, %v14_v10  ;;  %s54_s1 = sshll.u32 %s99_s0, 4  ;;  %s55_s1 = int_to_ptr.vmem [resolvable:$true] %s54_s1 }
  0x18   :  { %17 = vperm.xlu0 %67, %v13_v3  }
  0x76   :  { %v39_v16 = vpop.xlane.xlu2 %38 }
  0x77   :  { %v23_v5 = vpop.xlane.xlu0 %22  ;;  %v41_v19 = vmul.f32 0.0032258064, %v39_v16 }
  0x78   :  { %v24_v6 = vsub.f32 %v12_v0, %v23_v5 }
  0x7a   :  { %v25_v7 = vmul.f32 1.442695, %v24_v6 }
  0x7c   :  { %68 = vpow2.f32 %v25_v7 }
  0x82   :  { %v69_v8 = vpop.eup %68 }
  0x83   :  { %v27_v9 = vsel %vm20_vm0, %v69_v8, 0.0 }
  0x84   :  { %28 = vadd.xlane.f32.xlu1 %v27_v9 }
  0x8a   :  { %v18_v12 = vpop.permute.xlu0 %17 }
  0x8b   :  { %vm19_vm1 = vcmp.eq.s32.totalorder %v15_v11, %v18_v12 }
  0x8c   :  { %v33_v13 = vsel %vm19_vm1, %v12_v0, 0.0 }
  0x8d   :  { %v34_v14 = vsel %vm20_vm0, %v33_v13, 0.0 }
  0x8e   :  { %35 = vadd.xlane.f32.xlu1 %v34_v14 }
  0xf7   :  { %v29_v15 = vpop.xlane.xlu1 %28 }
  0xf8   :  { %70 = vlog2.f32 %v29_v15 }
  0xfe   :  { %v71_v17 = vpop.eup %70 }
  0xff   :  { %v31_v18 = vmul.f32 0.6931472, %v71_v17 }
 0x101   :  { %v36_v20 = vpop.xlane.xlu1 %35  ;;  %v32_v22 = vadd.f32 %v31_v18, %v23_v5 }
 0x102   :  { %v40_v21 = vmul.f32 0.8967742, %v36_v20 }
 0x104   :  { %v42_v23 = vadd.f32 %v41_v19, %v40_v21 }
 0x106   :  { %v43_v24 = vsub.f32 %v32_v22, %v42_v23 }
 0x108   :  { %v45_v25 = vperm.slane %v43_v24, %v15_v11 }
 0x10a   :  { %48 = vst.msk [vmem:[#allocation2] sm:$0x1] %vm47_vm2, %v45_v25 }
 0x10b   :  { %59 = dma.vmem_to_hbm [thread:$0]  %s55_s1, 16, %s57_s15, [#allocation3]  }
 0x10c   :  { %96 = dma.done.wait [#allocation3], 16  }
 0x10d   :  { %97 = vsyncadd [#allocation3], 4294967280 }
 0x10e   :  { %64 = vsyncpa [#allocation3], 1 }

</bundles_post_ra>
